<compile_context>
chip_gen: v7x
topology: tpu7x:2x2x1
jax: 0.10.0
libtpu: 0.0.40
codegen_flags: <defaults>
</compile_context>

<pallas_src>
import functools
import math

import jax
import jax.numpy as jnp
from jax.experimental import pallas as pl
from jax.experimental.pallas import tpu as pltpu


def _round_up(v, m):
    return ((v + m - 1) // m) * m


def _vmem_capacity_bytes():
    try:
        return int(pltpu.get_tpu_info().vmem_capacity_bytes)
    except Exception:
        return 64 * (1 << 20)  # conservative default (v7x-sized VMEM)


def _device_kind():
    try:
        return jax.devices()[0].device_kind.lower()
    except Exception:
        return ""


def _decomp_kernel(xf_ref, x_ref, w_ref, trend_ref, res_ref, *, bt, c):
    """One (batch-tile, seq-column-tile) block of the fused decomposition.

    xf_ref:    (bt*C, S)    flat rows of x (same bytes as x, flat view)
    x_ref:     (bt, ts, C)  [B,S,C]-layout view of x for this column tile
    w_ref:     (S, ts)      averaging-matrix columns (or whole (S, S) resident)
    trend_ref: (bt, ts, C)
    res_ref:   (bt, ts, C)
    """
    lhs = xf_ref[...]
    if lhs.dtype != w_ref.dtype:                # v5e fast path: bf16 operands,
        lhs = lhs.astype(w_ref.dtype)           # f32 accumulation below.
    # Moving average of every flat row for this column tile: one MXU matmul
    # with M = bt*C, N = ts, K = S.  All FLOPs live on the otherwise-idle MXU.
    ma = jnp.dot(lhs, w_ref[...], preferred_element_type=jnp.float32)  # (bt*C, ts)

    x32 = x_ref[...].astype(jnp.float32)        # subtract in f32, cast at store
    # (bt*C, ts) -> (bt, ts, C): cheap static sublane (row) slices of the f32
    # result plus one small 2-D transpose per batch (no lane slicing of ma).
    for bb in range(bt):
        t_b = ma[bb * c:(bb + 1) * c, :].T                      # (ts, C) f32
        trend_ref[bb] = t_b.astype(trend_ref.dtype)
        res_ref[bb] = (x32[bb] - t_b).astype(res_ref.dtype)


def series_decomposition(x, kernel_size=None):
    """Returns (residual, trend), both [batch, seq_len, channels]."""
    b, s, c = x.shape
    k = kernel_size
    if k is None:
        k = max(3, s // 10)
    if k % 2 == 0:
        k += 1
    p = (k - 1) // 2

    itemsize = jnp.dtype(x.dtype).itemsize
    kind = _device_kind()
    is_v5e = ("v5 lite" in kind) or ("v5e" in kind) or ("v5lite" in kind)

    # Generation-aware VMEM budgeting (128 MiB on v5e/v6e, 64 MiB on v7x).
    cap = _vmem_capacity_bytes()
    budget = cap // 2                  # target for the per-step block footprint
    vmem_limit = int(cap * 0.85)

    # v5e: f32 MXU throughput makes the dense-W trick MXU-bound for long
    # sequences; use bf16 operands there (f32 accumulation keeps accuracy).
    mxu_dtype = x.dtype
    if is_v5e and x.dtype == jnp.float32 and s >= 1024:
        mxu_dtype = jnp.bfloat16
    w_itemsize = jnp.dtype(mxu_dtype).itemsize

    # Static banded averaging matrix:
    #   (xf @ W)[r, i] = (1/k) * sum_{j: |j-i|<=p, 0<=j<S} xf[r, j]
    # == avg_pool1d(k, stride=1, padding=p) with count_include_pad=True.
    idx = jnp.arange(s, dtype=jnp.int32)
    w = (jnp.abs(idx[:, None] - idx[None, :]) <= p).astype(jnp.float32)
    w = (w * (1.0 / float(k))).astype(mxu_dtype)

    # ---------------------------- tiling selection ----------------------------
    pack = max(8, 32 // itemsize)      # sublane packing: 8 f32 / 16 bf16 / 32 i8
    bt0 = pack // math.gcd(c, pack)    # smallest bt with (bt*C) % pack == 0
    bt_cap = max(bt0, _round_up(b, bt0))

    def _w_bytes(ts_, n_s_):
        if n_s_ == 1:                  # whole W resident in VMEM, single copy
            return _round_up(s, 8) * _round_up(s, 128) * w_itemsize
        return 2 * _round_up(s, 8) * _round_up(ts_, 128) * w_itemsize

    def _est(bt_, ts_, n_s_):
        cl = _round_up(c, 128)
        sl = _round_up(s, 128)
        tl = _round_up(ts_, 128)
        tsp = _round_up(ts_, 8)
        est = 2 * _round_up(bt_ * c, pack) * sl * itemsize   # xf block (x2 bufs)
        est += 2 * bt_ * tsp * cl * itemsize                  # x block   (x2)
        est += 2 * 2 * bt_ * tsp * cl * itemsize              # trend+res (x2 each)
        est += bt_ * c * tl * 4 + bt_ * tsp * cl * 4          # f32 temporaries
        return est + _w_bytes(ts_, n_s_)

    # W-column (output-sequence) tiling keeps the W working set <= ~budget/3.
    # TODO(synk): for very long sequences a banded W block of width (ts + 2p)
    # would also cut the O(S^2) FLOPs and W re-reads; not implemented here.
    ts, n_s = s, 1
    while _w_bytes(ts, n_s) > budget // 3 and ts > 128:
        ts = max(128, _round_up(pl.cdiv(ts, 2), 128))
        n_s = pl.cdiv(s, ts)

    # Grow the batch tile until the matmul M-dim (bt*C) is MXU-friendly or the
    # VMEM budget is hit; never exceed the (padded) batch itself.
    m_target = 128 if is_v5e else 256
    bt = bt0
    while bt * c < m_target and bt < bt_cap and _est(2 * bt, ts, n_s) <= budget:
        bt *= 2
    bt = min(bt, bt_cap)

    bp = _round_up(b, bt)
    nblk = bp // bt

    # Give v7x's two TensorCores >= 2 independent "parallel" blocks even when
    # the batch axis alone yields only one.  Harmless on 1-TC chips.
    if nblk * n_s == 1 and s >= 256:
        ts = max(128, _round_up(pl.cdiv(s, 2), 128))
        n_s = pl.cdiv(s, ts)
    # --------------------------------------------------------------------------

    # Pad the batch axis so every block keeps an aligned sublane dimension.
    xp = x if bp == b else jnp.pad(x, ((0, bp - b), (0, 0), (0, 0)))
    xf = xp.reshape(bp * c, s)   # row-major flat view (same quirky reshape as torch)

    if n_s == 1:
        # Grid-invariant W: one whole copy resident in VMEM (not double-buffered).
        w_spec = pl.BlockSpec(memory_space=pltpu.MemorySpace.VMEM)
    else:
        w_spec = pl.BlockSpec((s, ts), lambda i, j: (0, j))

    kernel = functools.partial(_decomp_kernel, bt=bt, c=c)
    flops = 2 * (bp * c) * s * s
    bytes_accessed = 4 * b * s * c * itemsize + s * s * w_itemsize

    trend_p, residual_p = pl.pallas_call(
        kernel,
        out_shape=(
            jax.ShapeDtypeStruct((bp, s, c), x.dtype),   # trend
            jax.ShapeDtypeStruct((bp, s, c), x.dtype),   # residual
        ),
        grid=(nblk, n_s),
        in_specs=[
            pl.BlockSpec((bt * c, s), lambda i, j: (i, 0)),     # flat rows (full K)
            pl.BlockSpec((bt, ts, c), lambda i, j: (i, j, 0)),  # [B,S,C] view of x
            w_spec,
        ],
        out_specs=(
            pl.BlockSpec((bt, ts, c), lambda i, j: (i, j, 0)),
            pl.BlockSpec((bt, ts, c), lambda i, j: (i, j, 0)),
        ),
        compiler_params=pltpu.CompilerParams(
            dimension_semantics=("parallel", "parallel"),
            vmem_limit_bytes=vmem_limit,
        ),
        cost_estimate=pl.CostEstimate(
            flops=flops, transcendentals=0, bytes_accessed=bytes_accessed),
    )(xf, xp, w)

    if bp != b:
        trend_p = trend_p[:b]
        residual_p = residual_p[:b]
    return residual_p, trend_p


if __name__ == "__main__":
    key = jax.random.PRNGKey(0)

    # Pure-JAX reference mirroring the PyTorch module exactly (including its
    # reshape-without-transpose and count_include_pad=True behaviour).
    def _ref(x, kernel_size=None):
        b, s, c = x.shape
        k = kernel_size if kernel_size is not None else max(3, s // 10)
        if k % 2 == 0:
            k += 1
        p = (k - 1) // 2
        xf = x.reshape(b * c, s)
        xpad = jnp.pad(xf, ((0, 0), (p, p)))
        trend_flat = sum(xpad[:, d:d + s] for d in range(k)) / k
        trend = trend_flat.reshape(b, c, s).transpose(0, 2, 1)
        return x - trend, trend

    # Small primary shape, a shape exercising the batch-padding path, and a
    # longer sequence exercising the S-column tiling / second grid axis.
    for (B, S, C) in [(2, 16, 4), (3, 32, 5), (1, 512, 8)]:
        key, sub = jax.random.split(key)
        x = jax.random.normal(sub, (B, S, C), dtype=jnp.float32)

        residual, trend = series_decomposition(x)
        residual = jax.block_until_ready(residual)
        trend = jax.block_until_ready(trend)

        res_ref, trend_ref = _ref(x)
        assert trend.shape == (B, S, C) and residual.shape == (B, S, C)
        assert jnp.allclose(trend, trend_ref, atol=1e-4, rtol=1e-4), "trend mismatch"
        assert jnp.allclose(residual, res_ref, atol=1e-4, rtol=1e-4), "residual mismatch"

    print("KERNEL_OK")
</pallas_src>

<mosaic_0001>
module attributes {stable_mosaic.version = 11 : i64} {
  func.func @_decomp_kernel(%arg0: i32, %arg1: i32, %arg2: memref<8x16xf32, #tpu.memory_space<vmem>>, %arg3: memref<2x16x4xf32, #tpu.memory_space<vmem>>, %arg4: memref<16x16xf32, #tpu.memory_space<vmem>>, %arg5: memref<2x16x4xf32, #tpu.memory_space<vmem>>, %arg6: memref<2x16x4xf32, #tpu.memory_space<vmem>>) attributes {dimension_semantics = [#tpu.dimension_semantics<parallel>, #tpu.dimension_semantics<parallel>], iteration_bounds = array<i64: 1, 1>, scalar_prefetch = 0 : i64, scratch_operands = 0 : i64, tpu.core_type = #tpu.core_type<tc>, window_params = [{transform_indices = @transform_0, window_bounds = array<i64: 8, 16>}, {transform_indices = @transform_1, window_bounds = array<i64: 2, 16, 4>}, {pipeline_mode = #tpu.pipeline_mode<synchronous>, transform_indices = @transform_2, window_bounds = array<i64: 16, 16>}, {transform_indices = @transform_3, window_bounds = array<i64: 2, 16, 4>}, {transform_indices = @transform_4, window_bounds = array<i64: 2, 16, 4>}]} {
    %c0 = arith.constant 0 : index
    %c0_0 = arith.constant 0 : index
    %0 = vector.load %arg2[%c0, %c0_0] : memref<8x16xf32, #tpu.memory_space<vmem>>, vector<8x16xf32>
    %c0_1 = arith.constant 0 : index
    %c0_2 = arith.constant 0 : index
    %1 = vector.load %arg4[%c0_1, %c0_2] : memref<16x16xf32, #tpu.memory_space<vmem>>, vector<16x16xf32>
    %cst = arith.constant dense<0.000000e+00> : vector<8x16xf32>
    %2 = tpu.matmul %0, %1, %cst {dimension_numbers = #tpu.dot_dimension_numbers<[1], [0], [0], [1], [0, 0, 1, 1], [], []>} : vector<8x16xf32>, vector<16x16xf32>, vector<8x16xf32> -> vector<8x16xf32>
    %c0_3 = arith.constant 0 : index
    %c0_4 = arith.constant 0 : index
    %c0_5 = arith.constant 0 : index
    %3 = vector.load %arg3[%c0_3, %c0_4, %c0_5] : memref<2x16x4xf32, #tpu.memory_space<vmem>>, vector<2x16x4xf32>
    %4 = vector.extract_strided_slice %2 {offsets = [0, 0], sizes = [4, 16], strides = [1, 1]} : vector<8x16xf32> to vector<4x16xf32>
    %5 = tpu.transpose %4, [1, 0] : vector<4x16xf32> -> vector<16x4xf32>
    %c0_6 = arith.constant 0 : index
    %c0_7 = arith.constant 0 : index
    %c0_8 = arith.constant 0 : index
    %6 = vector.load %arg5[%c0_6, %c0_7, %c0_8] : memref<2x16x4xf32, #tpu.memory_space<vmem>>, vector<1x16x4xf32>
    %7 = vector.shape_cast %6 : vector<1x16x4xf32> to vector<16x4xf32>
    %8 = vector.shape_cast %5 : vector<16x4xf32> to vector<1x16x4xf32>
    tpu.vector_store %arg5[%c0_6, %c0_7, %c0_8], %8 {strides = array<i32>} : memref<2x16x4xf32, #tpu.memory_space<vmem>>, vector<1x16x4xf32>,
    %9 = vector.extract_strided_slice %3 {offsets = [0, 0, 0], sizes = [1, 16, 4], strides = [1, 1, 1]} : vector<2x16x4xf32> to vector<1x16x4xf32>
    %10 = vector.shape_cast %9 : vector<1x16x4xf32> to vector<16x4xf32>
    %11 = arith.subf %10, %5 : vector<16x4xf32>
    %c0_9 = arith.constant 0 : index
    %c0_10 = arith.constant 0 : index
    %c0_11 = arith.constant 0 : index
    %12 = vector.load %arg6[%c0_9, %c0_10, %c0_11] : memref<2x16x4xf32, #tpu.memory_space<vmem>>, vector<1x16x4xf32>
    %13 = vector.shape_cast %12 : vector<1x16x4xf32> to vector<16x4xf32>
    %14 = vector.shape_cast %11 : vector<16x4xf32> to vector<1x16x4xf32>
    tpu.vector_store %arg6[%c0_9, %c0_10, %c0_11], %14 {strides = array<i32>} : memref<2x16x4xf32, #tpu.memory_space<vmem>>, vector<1x16x4xf32>,
    %15 = vector.extract_strided_slice %2 {offsets = [4, 0], sizes = [4, 16], strides = [1, 1]} : vector<8x16xf32> to vector<4x16xf32>
    %16 = tpu.transpose %15, [1, 0] : vector<4x16xf32> -> vector<16x4xf32>
    %c1 = arith.constant 1 : index
    %c0_12 = arith.constant 0 : index
    %c0_13 = arith.constant 0 : index
    %17 = vector.load %arg5[%c1, %c0_12, %c0_13] : memref<2x16x4xf32, #tpu.memory_space<vmem>>, vector<1x16x4xf32>
    %18 = vector.shape_cast %17 : vector<1x16x4xf32> to vector<16x4xf32>
    %19 = vector.shape_cast %16 : vector<16x4xf32> to vector<1x16x4xf32>
    tpu.vector_store %arg5[%c1, %c0_12, %c0_13], %19 {strides = array<i32>} : memref<2x16x4xf32, #tpu.memory_space<vmem>>, vector<1x16x4xf32>,
    %20 = vector.extract_strided_slice %3 {offsets = [1, 0, 0], sizes = [1, 16, 4], strides = [1, 1, 1]} : vector<2x16x4xf32> to vector<1x16x4xf32>
    %21 = vector.shape_cast %20 : vector<1x16x4xf32> to vector<16x4xf32>
    %22 = arith.subf %21, %16 : vector<16x4xf32>
    %c1_14 = arith.constant 1 : index
    %c0_15 = arith.constant 0 : index
    %c0_16 = arith.constant 0 : index
    %23 = vector.load %arg6[%c1_14, %c0_15, %c0_16] : memref<2x16x4xf32, #tpu.memory_space<vmem>>, vector<1x16x4xf32>
    %24 = vector.shape_cast %23 : vector<1x16x4xf32> to vector<16x4xf32>
    %25 = vector.shape_cast %22 : vector<16x4xf32> to vector<1x16x4xf32>
    tpu.vector_store %arg6[%c1_14, %c0_15, %c0_16], %25 {strides = array<i32>} : memref<2x16x4xf32, #tpu.memory_space<vmem>>, vector<1x16x4xf32>,
    return
  }
  func.func @transform_0(%arg0: i32, %arg1: i32) -> (i32, i32) {
    %c0_i32 = arith.constant 0 : i32
    %c0_i32_0 = arith.constant 0 : i32
    return %arg0, %c0_i32 : i32, i32
  }
  func.func @transform_1(%arg0: i32, %arg1: i32) -> (i32, i32, i32) {
    %c0_i32 = arith.constant 0 : i32
    %c0_i32_0 = arith.constant 0 : i32
    return %arg0, %arg1, %c0_i32 : i32, i32, i32
  }
  func.func @transform_2(%arg0: i32, %arg1: i32) -> (i32, i32) {
    %c0_i32 = arith.constant 0 : i32
    %c0_i32_0 = arith.constant 0 : i32
    %c0_i32_1 = arith.constant 0 : i32
    return %c0_i32, %c0_i32_0 : i32, i32
  }
  func.func @transform_3(%arg0: i32, %arg1: i32) -> (i32, i32, i32) {
    %c0_i32 = arith.constant 0 : i32
    %c0_i32_0 = arith.constant 0 : i32
    return %arg0, %arg1, %c0_i32 : i32, i32, i32
  }
  func.func @transform_4(%arg0: i32, %arg1: i32) -> (i32, i32, i32) {
    %c0_i32 = arith.constant 0 : i32
    %c0_i32_0 = arith.constant 0 : i32
    return %arg0, %arg1, %c0_i32 : i32, i32, i32
  }
}

</mosaic_0001>

<bundles_post_ra>
// kernel: tpu_custom_call.1
= control target key start
LH: loop header
LB: loop body
LE: loop exit
PB: predicated region body
PF: predicated region fallthrough
CT: control target
= control target key end

     0   :  { %v208_v0 = vmov 0.0|0.0   ;;  %vm209_vm0 = vmmov 0   ;;  %v210_v3 = vmov 0.0   ;;  %vm19_vm1 = vcmask 130048   ;;  %s289_s2 = inlined_call_operand.vmem [shape: f32[16,16], index: 2, kind: input, shape index: {}]   ;;  %s290_s0 = inlined_call_operand.vmem [shape: f32[8,16], index: 0, kind: input, shape index: {}]   ;;  %s291_s1 = inlined_call_operand.vmem [shape: f32[2,16,4], index: 1, kind: input, shape index: {}]   ;;  %s292_s3 = inlined_call_operand.vmem [shape: f32[2,16,4], index: 3, kind: output, shape index: {0}]   ;;  %s293_s4 = inlined_call_operand.vmem [shape: f32[2,16,4], index: 4, kind: output, shape index: {1}]  }
   0x1   :  { %202 = vmatprep.subr.bf16.mxu0 %v208_v0  ;;  %v17_v1 = vld [vmem:[%s289_s2] sm:$0xff]  ;;  %v18_v2 = vld [vmem:[%s289_s2 + $0x8] sm:$0xff]  ;;  %199 = vmatprep.mubr.msk.f32.mxu0 %vm209_vm0, %v210_v3  ;;  %vm129_vm2 = vcmask 31744   ;;  %v95_v15 = vld [vmem:[%s291_s1 + $0x10] sm:$0xff] }
   0x2   :  { %v203_v4 = vpack.c.bf16 %v18_v2, %v17_v1  ;;  %v16_v5 = vld [vmem:[%s290_s0] sm:$0xff]  ;;  %v94_v12 = vld [vmem:[%s291_s1 + $0x8] sm:$0xff]  ;;  %v96_v18 = vld [vmem:[%s291_s1 + $0x18] sm:$0xff] }
   0x3   :  { %v93_v9 = vld [vmem:[%s291_s1] sm:$0xff] }
   0x4   :  { %204 = vmatpush3.bf16.msra.mxu0 %v203_v4 }
   0x7   :  { %200 = vmatmul.mubr.msk.f32.vlgmr.msra.gmra.mrb[0].mxu0 %vm19_vm1, %v16_v5 }
  0xda   :  { %v89_v6 = vpop.f32.mrb[0].mxu0 }
  0xdb   :  { %97 = vxpose.xlu0.b32.start.end [1/1] (short) (narrow) %v89_v6, 16  ;;  %v201_v7 = vpop.f32.mrb[1].mxu0  ;;  %v137_v8 = vrot.slane %v89_v6, 4 }
  0xe0   :  { %139 = vxpose.xlu0.b32.start.end [1/1] (short) (narrow) %v137_v8, 16 }
 0x15b   :  { %v113_v10 = vpop.trf.xlu0 }
 0x15c   :  { %130 = vst.msk [vmem:[%s292_s3] sm:$0xff] %vm129_vm2, %v113_v10  ;;  %v132_v11 = vsub.f32 %v93_v9, %v113_v10 }
 0x15e   :  { %134 = vst.msk [vmem:[%s293_s4] sm:$0xff] %vm129_vm2, %v132_v11 }
 0x15f   :  { %v114_v13 = vpop.trf.xlu0 }
 0x160   :  { %131 = vst.msk [vmem:[%s292_s3 + $0x8] sm:$0xff] %vm129_vm2, %v114_v13  ;;  %v133_v14 = vsub.f32 %v94_v12, %v114_v13 }
 0x162   :  { %135 = vst.msk [vmem:[%s293_s4 + $0x8] sm:$0xff] %vm129_vm2, %v133_v14 }
 0x163   :  { %v155_v16 = vpop.trf.xlu0 }
 0x164   :  { %188 = vst.msk [vmem:[%s292_s3 + $0x10] sm:$0xff] %vm129_vm2, %v155_v16  ;;  %v174_v17 = vsub.f32 %v95_v15, %v155_v16 }
 0x166   :  { %190 = vst.msk [vmem:[%s293_s4 + $0x10] sm:$0xff] %vm129_vm2, %v174_v17 }
 0x167   :  { %v156_v19 = vpop.trf.xlu0 }
 0x168   :  { %189 = vst.msk [vmem:[%s292_s3 + $0x18] sm:$0xff] %vm129_vm2, %v156_v19  ;;  %v175_v20 = vsub.f32 %v96_v18, %v156_v19 }
 0x16a   :  { %191 = vst.msk [vmem:[%s293_s4 + $0x18] sm:$0xff] %vm129_vm2, %v175_v20 }

</bundles_post_ra>
